<compile_context>
chip_gen: v7x
topology: tpu7x:2x2x1
jax: 0.10.0
libtpu: 0.0.40
codegen_flags: <defaults>
</compile_context>

<pallas_src>
import jax
import jax.numpy as jnp
from jax.experimental import pallas as pl
from jax.experimental.pallas import tpu as pltpu


def _occ_criterion_kernel(logits_ref, labels_ref, mask_ref, w_ref, p_ref, out_ref):
    x = logits_ref[0].astype(jnp.float32)     # (C, T)
    t = labels_ref[0].astype(jnp.float32)     # (C, T)  in-kernel int8 -> f32 cast
    m = mask_ref[0].astype(jnp.float32)       # (1, T)  in-kernel int8 -> f32 cast
    w = w_ref[...]                            # (C, 1)  per-class weight
    p = p_ref[...]                            # (C, 1)  per-class prior

    # Numerically stable BCE-with-logits, shared softplus term computed once.
    base = jnp.maximum(x, 0.0) + jnp.log1p(jnp.exp(-jnp.abs(x)))
    bce = base - x * t                        # BCE(x, labels)
    unc = base - x * p                        # BCE(x, priors): implicit (C,1)->(C,T) broadcast

    # Masked reductions over the spatial (lane) axis -> per-class sums,
    # then apply class weights to the tiny (C,1) vector only.
    bce_c = jnp.sum(bce * m, axis=1, keepdims=True)            # (C, 1)
    unc_c = jnp.sum(unc * (1.0 - m), axis=1, keepdims=True)    # (C, 1)
    bce_part = jnp.sum(bce_c * w)             # scalar partial: sum(bce * mask * class_w)
    unc_part = jnp.sum(unc_c)                 # scalar partial: sum(unc * (1 - mask))

    # Lane-dense (1,1,8,128) partial-sum slab: element (0,0)=bce, (0,1)=unc.
    shape4 = (1, 1, 8, 128)
    sub = jax.lax.broadcasted_iota(jnp.int32, shape4, 2)
    lane = jax.lax.broadcasted_iota(jnp.int32, shape4, 3)
    zero = jnp.zeros(shape4, jnp.float32)
    slab = jnp.where((sub == 0) & (lane == 0), bce_part, zero)
    slab = slab + jnp.where((sub == 0) & (lane == 1), unc_part, zero)
    out_ref[...] = slab


def _pick_hw_tile(hw, cap=4096):
    """Largest multiple of 128 dividing hw (<= cap); falls back to full extent."""
    if hw % 128 != 0:
        return hw                      # full-extent block is always legal
    cap = min(hw, cap)
    for cand in range(cap - cap % 128, 127, -128):
        if hw % cand == 0:
            return cand
    return hw


def vae_occupancy_criterion(logits, labels, mask, mu, logvar, priors,
                            xent_weight=0.9, uncert_weight=0.0,
                            weight_mode='sqrt_inverse', kld_weight=0.1):
    N, C, H, W = logits.shape
    HW = H * W
    T = _pick_hw_tile(HW)
    n_tiles = HW // T

    priors = jnp.asarray(priors, jnp.float32)
    if weight_mode == 'inverse':
        class_weights = 1.0 / priors
    elif weight_mode == 'sqrt_inverse':
        class_weights = jnp.sqrt(1.0 / priors)
    elif weight_mode == 'equal':
        class_weights = jnp.ones_like(priors)
    else:
        raise ValueError('Unknown weight mode option: ' + weight_mode)

    # Layout glue only — no float32 upcast of the bool/int inputs.
    logits_k = logits.reshape(N, C, HW)
    labels_k = labels.reshape(N, C, HW)
    if labels_k.dtype == jnp.bool_:
        labels_k = labels_k.astype(jnp.int8)
    mask_k = mask.reshape(N, 1, HW)
    if mask_k.dtype == jnp.bool_:
        mask_k = mask_k.astype(jnp.int8)
    w = class_weights.reshape(C, 1).astype(jnp.float32)
    p = priors.reshape(C, 1).astype(jnp.float32)

    parts = pl.pallas_call(
        _occ_criterion_kernel,
        out_shape=jax.ShapeDtypeStruct((N, n_tiles, 8, 128), jnp.float32),
        grid_spec=pltpu.PrefetchScalarGridSpec(
            num_scalar_prefetch=0,
            grid=(N, n_tiles),
            in_specs=[
                pl.BlockSpec((1, C, T), lambda n, t: (n, 0, t)),   # logits
                pl.BlockSpec((1, C, T), lambda n, t: (n, 0, t)),   # labels (int8)
                pl.BlockSpec((1, 1, T), lambda n, t: (n, 0, t)),   # mask (int8)
                pl.BlockSpec((C, 1), lambda n, t: (0, 0)),         # class weights
                pl.BlockSpec((C, 1), lambda n, t: (0, 0)),         # priors
            ],
            out_specs=pl.BlockSpec((1, 1, 8, 128), lambda n, t: (n, t, 0, 0)),
        ),
        compiler_params=pltpu.CompilerParams(
            dimension_semantics=("parallel", "parallel")),
    )(logits_k, labels_k, mask_k, w, p)

    totals = parts.sum(axis=(0, 1))            # (8, 128)
    n_elem = N * C * HW
    bce_loss = totals[0, 0] / n_elem           # mean over all elements
    uncert_loss = totals[0, 1] / n_elem

    # KL term is O(N*L) (tiny); computed in plain JAX per performance review.
    mu_f = mu.astype(jnp.float32)
    lv_f = logvar.astype(jnp.float32)
    kld_loss = -0.5 * jnp.mean(1.0 + lv_f - mu_f * mu_f - jnp.exp(lv_f))

    return (bce_loss * xent_weight
            + uncert_loss * uncert_weight
            + kld_loss * kld_weight)


def _reference(logits, labels, mask, mu, logvar, priors,
               xent_weight=0.9, uncert_weight=0.0, kld_weight=0.1):
    # pure-JAX reference of the PyTorch semantics, for validation only
    priors = jnp.asarray(priors, jnp.float32)
    cw = jnp.sqrt(1.0 / priors)
    x = logits.astype(jnp.float32)
    t = labels.astype(jnp.float32)
    m = mask.astype(jnp.float32)[:, None]                 # (N,1,H,W)
    bce = jnp.maximum(x, 0) - x * t + jnp.log1p(jnp.exp(-jnp.abs(x)))
    bce_loss = jnp.mean(bce * (m * cw[None, :, None, None]))
    pr = jnp.broadcast_to(priors[None, :, None, None], x.shape)
    unc = jnp.maximum(x, 0) - x * pr + jnp.log1p(jnp.exp(-jnp.abs(x)))
    uncert_loss = jnp.mean(unc * (1.0 - m))
    kld = -0.5 * jnp.mean(1.0 + logvar - mu ** 2 - jnp.exp(logvar))
    return bce_loss * xent_weight + uncert_loss * uncert_weight + kld * kld_weight


if __name__ == "__main__":
    key = jax.random.PRNGKey(0)
    k1, k2, k3, k4, k5 = jax.random.split(key, 5)

    N, C, H, W, L = 2, 4, 16, 16, 32
    logits = jax.random.normal(k1, (N, C, H, W), jnp.float32)
    labels = jax.random.uniform(k2, (N, C, H, W)) > 0.5       # bool labels
    mask = jax.random.uniform(k3, (N, H, W)) > 0.3            # bool visibility mask
    mu = jax.random.normal(k4, (N, L), jnp.float32)
    logvar = 0.1 * jax.random.normal(k5, (N, L), jnp.float32)
    priors = [0.3, 0.1, 0.05, 0.02]                           # deterministic per-class priors

    # use a nonzero uncert_weight so all three loss terms are exercised
    loss = vae_occupancy_criterion(logits, labels, mask, mu, logvar, priors,
                                   xent_weight=0.9, uncert_weight=0.05,
                                   kld_weight=0.1)
    loss = jax.block_until_ready(loss)

    ref = _reference(logits, labels, mask, mu, logvar, priors,
                     xent_weight=0.9, uncert_weight=0.05, kld_weight=0.1)
    assert jnp.isfinite(loss), "kernel produced non-finite loss"
    assert abs(float(loss) - float(ref)) <= 1e-4 * (1.0 + abs(float(ref))), \
        f"mismatch: kernel={float(loss)} ref={float(ref)}"

    print("KERNEL_OK")
</pallas_src>

<mosaic_0001>
module attributes {stable_mosaic.version = 11 : i64} {
  func.func @_occ_criterion_kernel(%arg0: i32, %arg1: i32, %arg2: memref<1x4x256xf32, #tpu.memory_space<vmem>>, %arg3: memref<1x4x256xi8, #tpu.memory_space<vmem>>, %arg4: memref<1x1x256xi8, #tpu.memory_space<vmem>>, %arg5: memref<4x1xf32, #tpu.memory_space<vmem>>, %arg6: memref<4x1xf32, #tpu.memory_space<vmem>>, %arg7: memref<1x1x8x128xf32, #tpu.memory_space<vmem>>) attributes {dimension_semantics = [#tpu.dimension_semantics<parallel>, #tpu.dimension_semantics<parallel>], iteration_bounds = array<i64: 2, 1>, scalar_prefetch = 0 : i64, scratch_operands = 0 : i64, tpu.core_type = #tpu.core_type<tc>, window_params = [{transform_indices = @transform_0, window_bounds = array<i64: 1, 4, 256>}, {transform_indices = @transform_1, window_bounds = array<i64: 1, 4, 256>}, {transform_indices = @transform_2, window_bounds = array<i64: 1, 1, 256>}, {pipeline_mode = #tpu.pipeline_mode<synchronous>, transform_indices = @transform_3, window_bounds = array<i64: 4, 1>}, {pipeline_mode = #tpu.pipeline_mode<synchronous>, transform_indices = @transform_4, window_bounds = array<i64: 4, 1>}, {transform_indices = @transform_5, window_bounds = array<i64: 1, 1, 8, 128>}]} {
    %c0 = arith.constant 0 : index
    %c0_0 = arith.constant 0 : index
    %c0_1 = arith.constant 0 : index
    %0 = vector.load %arg2[%c0, %c0_0, %c0_1] : memref<1x4x256xf32, #tpu.memory_space<vmem>>, vector<1x4x256xf32>
    %1 = vector.shape_cast %0 : vector<1x4x256xf32> to vector<4x256xf32>
    %c0_2 = arith.constant 0 : index
    %c0_3 = arith.constant 0 : index
    %c0_4 = arith.constant 0 : index
    %2 = vector.load %arg3[%c0_2, %c0_3, %c0_4] : memref<1x4x256xi8, #tpu.memory_space<vmem>>, vector<1x4x256xi8>
    %3 = vector.shape_cast %2 : vector<1x4x256xi8> to vector<4x256xi8>
    %4 = arith.sitofp %3 : vector<4x256xi8> to vector<4x256xf32>
    %c0_5 = arith.constant 0 : index
    %c0_6 = arith.constant 0 : index
    %c0_7 = arith.constant 0 : index
    %5 = vector.load %arg4[%c0_5, %c0_6, %c0_7] : memref<1x1x256xi8, #tpu.memory_space<vmem>>, vector<1x1x256xi8>
    %6 = vector.shape_cast %5 : vector<1x1x256xi8> to vector<1x256xi8>
    %7 = arith.sitofp %6 : vector<1x256xi8> to vector<1x256xf32>
    %c0_8 = arith.constant 0 : index
    %c0_9 = arith.constant 0 : index
    %8 = vector.load %arg5[%c0_8, %c0_9] : memref<4x1xf32, #tpu.memory_space<vmem>>, vector<4x1xf32>
    %c0_10 = arith.constant 0 : index
    %c0_11 = arith.constant 0 : index
    %9 = vector.load %arg6[%c0_10, %c0_11] : memref<4x1xf32, #tpu.memory_space<vmem>>, vector<4x1xf32>
    %cst = arith.constant 0.000000e+00 : f32
    %10 = vector.broadcast %cst : f32 to vector<4x256xf32>
    %11 = arith.maximumf %1, %10 : vector<4x256xf32>
    %12 = math.absf %1 : vector<4x256xf32>
    %cst_12 = arith.constant 0.000000e+00 : f32
    %13 = vector.broadcast %cst_12 : f32 to vector<4x256xf32>
    %14 = arith.subf %13, %12 : vector<4x256xf32>
    %15 = math.exp %14 : vector<4x256xf32>
    %16 = math.log1p %15 : vector<4x256xf32>
    %17 = arith.addf %11, %16 : vector<4x256xf32>
    %18 = arith.mulf %1, %4 : vector<4x256xf32>
    %19 = arith.subf %17, %18 : vector<4x256xf32>
    %20 = vector.broadcast %9 : vector<4x1xf32> to vector<4x256xf32>
    %21 = arith.mulf %1, %20 : vector<4x256xf32>
    %22 = arith.subf %17, %21 : vector<4x256xf32>
    %23 = vector.broadcast %7 : vector<1x256xf32> to vector<4x256xf32>
    %24 = arith.mulf %19, %23 : vector<4x256xf32>
    %cst_13 = arith.constant dense<0.000000e+00> : vector<4xf32>
    %25 = vector.multi_reduction <add>, %24, %cst_13 [1] : vector<4x256xf32> to vector<4xf32>
    %26 = vector.shape_cast %25 : vector<4xf32> to vector<4x1xf32>
    %cst_14 = arith.constant 1.000000e+00 : f32
    %27 = vector.broadcast %cst_14 : f32 to vector<1x256xf32>
    %28 = arith.subf %27, %7 : vector<1x256xf32>
    %29 = vector.broadcast %28 : vector<1x256xf32> to vector<4x256xf32>
    %30 = arith.mulf %22, %29 : vector<4x256xf32>
    %cst_15 = arith.constant dense<0.000000e+00> : vector<4xf32>
    %31 = vector.multi_reduction <add>, %30, %cst_15 [1] : vector<4x256xf32> to vector<4xf32>
    %32 = vector.shape_cast %31 : vector<4xf32> to vector<4x1xf32>
    %33 = arith.mulf %26, %8 : vector<4x1xf32>
    %34 = vector.shape_cast %33 : vector<4x1xf32> to vector<1x4x1xf32>
    %cst_16 = arith.constant dense<0.000000e+00> : vector<1xf32>
    %35 = vector.multi_reduction <add>, %34, %cst_16 [1, 2] : vector<1x4x1xf32> to vector<1xf32>
    %36 = vector.shape_cast %35 : vector<1xf32> to vector<1x1x1xf32>
    %37 = vector.extract %36[0, 0, 0] : f32 from vector<1x1x1xf32>
    %38 = vector.shape_cast %32 : vector<4x1xf32> to vector<1x4x1xf32>
    %cst_17 = arith.constant dense<0.000000e+00> : vector<1xf32>
    %39 = vector.multi_reduction <add>, %38, %cst_17 [1, 2] : vector<1x4x1xf32> to vector<1xf32>
    %40 = vector.shape_cast %39 : vector<1xf32> to vector<1x1x1xf32>
    %41 = vector.extract %40[0, 0, 0] : f32 from vector<1x1x1xf32>
    %42 = tpu.iota {dimensions = array<i32: 2>} : vector<1x1x8x128xi32>
    %43 = tpu.iota {dimensions = array<i32: 3>} : vector<1x1x8x128xi32>
    %cst_18 = arith.constant 0.000000e+00 : f32
    %44 = vector.broadcast %cst_18 : f32 to vector<1x1x8x128xf32>
    %c0_i32 = arith.constant 0 : i32
    %45 = vector.broadcast %c0_i32 : i32 to vector<1x1x8x128xi32>
    %46 = arith.cmpi eq, %42, %45 : vector<1x1x8x128xi32>
    %c0_i32_19 = arith.constant 0 : i32
    %47 = vector.broadcast %c0_i32_19 : i32 to vector<1x1x8x128xi32>
    %48 = arith.cmpi eq, %43, %47 : vector<1x1x8x128xi32>
    %49 = arith.andi %46, %48 : vector<1x1x8x128xi1>
    %50 = vector.broadcast %37 : f32 to vector<1x1x8x128xf32>
    %51 = arith.select %49, %50, %44 : vector<1x1x8x128xi1>, vector<1x1x8x128xf32>
    %c0_i32_20 = arith.constant 0 : i32
    %52 = vector.broadcast %c0_i32_20 : i32 to vector<1x1x8x128xi32>
    %53 = arith.cmpi eq, %42, %52 : vector<1x1x8x128xi32>
    %c1_i32 = arith.constant 1 : i32
    %54 = vector.broadcast %c1_i32 : i32 to vector<1x1x8x128xi32>
    %55 = arith.cmpi eq, %43, %54 : vector<1x1x8x128xi32>
    %56 = arith.andi %53, %55 : vector<1x1x8x128xi1>
    %57 = vector.broadcast %41 : f32 to vector<1x1x8x128xf32>
    %58 = arith.select %56, %57, %44 : vector<1x1x8x128xi1>, vector<1x1x8x128xf32>
    %59 = arith.addf %51, %58 : vector<1x1x8x128xf32>
    %c0_21 = arith.constant 0 : index
    %c0_22 = arith.constant 0 : index
    %c0_23 = arith.constant 0 : index
    %c0_24 = arith.constant 0 : index
    %60 = vector.load %arg7[%c0_21, %c0_22, %c0_23, %c0_24] : memref<1x1x8x128xf32, #tpu.memory_space<vmem>>, vector<1x1x8x128xf32>
    tpu.vector_store %arg7[%c0_21, %c0_22, %c0_23, %c0_24], %59 {strides = array<i32>} : memref<1x1x8x128xf32, #tpu.memory_space<vmem>>, vector<1x1x8x128xf32>,
    return
  }
  func.func @transform_0(%arg0: i32, %arg1: i32) -> (i32, i32, i32) {
    %c0_i32 = arith.constant 0 : i32
    %c0_i32_0 = arith.constant 0 : i32
    return %arg0, %c0_i32, %arg1 : i32, i32, i32
  }
  func.func @transform_1(%arg0: i32, %arg1: i32) -> (i32, i32, i32) {
    %c0_i32 = arith.constant 0 : i32
    %c0_i32_0 = arith.constant 0 : i32
    return %arg0, %c0_i32, %arg1 : i32, i32, i32
  }
  func.func @transform_2(%arg0: i32, %arg1: i32) -> (i32, i32, i32) {
    %c0_i32 = arith.constant 0 : i32
    %c0_i32_0 = arith.constant 0 : i32
    return %arg0, %c0_i32, %arg1 : i32, i32, i32
  }
  func.func @transform_3(%arg0: i32, %arg1: i32) -> (i32, i32) {
    %c0_i32 = arith.constant 0 : i32
    %c0_i32_0 = arith.constant 0 : i32
    %c0_i32_1 = arith.constant 0 : i32
    return %c0_i32, %c0_i32_0 : i32, i32
  }
  func.func @transform_4(%arg0: i32, %arg1: i32) -> (i32, i32) {
    %c0_i32 = arith.constant 0 : i32
    %c0_i32_0 = arith.constant 0 : i32
    %c0_i32_1 = arith.constant 0 : i32
    return %c0_i32, %c0_i32_0 : i32, i32
  }
  func.func @transform_5(%arg0: i32, %arg1: i32) -> (i32, i32, i32, i32) {
    %c0_i32 = arith.constant 0 : i32
    %c0_i32_0 = arith.constant 0 : i32
    %c0_i32_1 = arith.constant 0 : i32
    return %arg0, %arg1, %c0_i32, %c0_i32_0 : i32, i32, i32, i32
  }
}

</mosaic_0001>

<bundles_post_ra>
// kernel: tpu_custom_call.1
= control target key start
LH: loop header
LB: loop body
LE: loop exit
PB: predicated region body
PF: predicated region fallthrough
CT: control target
= control target key end

     0   :  { %10 = vsyncpa [#allocation3], 0  ;;  %s1036_s0 = inlined_call_operand.hbm [shape: f32[2,4,256], index: 0, kind: input, shape index: {}]   ;;  %s1037_s1 = inlined_call_operand.vmem [shape: s8[2,4,256], index: 1, kind: input, shape index: {}]   ;;  %s1038_s2 = inlined_call_operand.vmem [shape: s8[2,1,256], index: 2, kind: input, shape index: {}]   ;;  %s1039_s3 = inlined_call_operand.vmem [shape: f32[4,1], index: 3, kind: input, shape index: {}]   ;;  %s1040_s4 = inlined_call_operand.vmem [shape: f32[4,1], index: 4, kind: input, shape index: {}]   ;;  %s1041_s5 = inlined_call_operand.hbm [shape: f32[2,1,8,128], index: 5, kind: output, shape index: {}]  }
   0x1   :  { %12 = vsyncpa [#allocation3 + $0x1], 0 }
   0x2   :  { %13 = vsyncpa [#allocation4], 0 }
   0x3   :  { %15 = vsyncpa [#allocation4 + $0x1], 0  ;;  %s834_s18 = smov 0   ;;  %s836_s19 = smov 0  }
   0x4   :  { %s838_s20 = smov 0   ;;  %s840_s21 = smov 0  }
   0x5   :  { %s842_s22 = smov 0   ;;  %s844_s23 = smov 0  }
   0x6 LB: > { %s596_s24 = sadd.s32 4294967295, %s798_s23   ;;  %s597_s25 = sadd.s32 4294967294, %s798_s23   ;;  %s798_s23 = sphi %s844_s23, %s21_s23   ;;  %s794_s22 = sphi %s842_s22, %s1057_s22   ;;  %s790_s21 = sphi %s840_s21, %s1056_s21   ;;  %s786_s20 = sphi %s838_s20, %s1055_s20   ;;  %s782_s19 = sphi %s836_s19, %s1054_s19   ;;  %s778_s18 = sphi %s834_s18, %s1053_s18  }
   0x7   : > { %s33_s26 = sadd.s32 1, %s794_s22  ;;  %s42_s27 = sadd.s32 1, %s786_s20 }
   0x8   : > { %p35_p0 = scmp.ge.s32.totalorder %s33_s26, 2  ;;  %p49_p1 = scmp.ne.s32.totalorder %s786_s20, %s782_s19 }
   0x9   : > { %p50_p2 = scmp.eq.s32.totalorder %s798_s23, 0  ;;  %p55_p3 = scmp.ne.s32.totalorder %s782_s19, %s778_s18 }
   0xa   : > { %s1059_s26 = smov (%p35_p0, %s33_s26), 0  ;;  %p56_p5 = scmp.eq.s32.totalorder %s596_s24, 0 }
   0xb   : > { %p875_p4 = por %p50_p2, %p49_p1  ;;  %s37_s29 = ssub.s32 %s794_s22, %s1059_s26 }
   0xc   : > { %p179_p6 = scmp.eq.s32.totalorder %s596_s24, 1  ;;  %p40_p7 = scmp.eq.s32.totalorder %s37_s29, 0 }
   0xd   : > { %p881_p8 = por %p56_p5, %p55_p3  ;;  %p185_p10 = scmp.eq.s32.totalorder %s597_s25, 1 }
   0xe   : > { %p885_p9 = por %p179_p6, %p49_p1  ;;  %p629_p13 = scmp.lt.s32.totalorder %s798_s23, 2 }
   0xf   : > { %s890_s7 = scalar_select %p40_p7, %s786_s20, %s42_s27  }
  0x10   : > { %s1045_s6 = scalar_select %p885_p9, 1, 0 }
  0x11   : > { %p892_p11 = por %p185_p10, %p55_p3  ;;  %s211_s9 = sand.u32 1, %s786_s20  }
  0x12   : > { %s600_s10 = sshll.u32 %s211_s9, 3  ;;  %s612_s11 = sshll.u32 %s794_s22, 7 }
  0x13   : > { %s1046_s8 = scalar_select %p892_p11, 1, 0 }
  0x14   : > { %s903_s14 = scalar_lea.hbm %s1036_s0, %s612_s11  ;;  %s215_s15 = scalar_lea.vmem [#allocation2], %s600_s10 }
  0x15   : > { %s225_s16 = sshll.u32 %s215_s15, 4  ;;  %p909_p0 = pnand %p629_p13, %p875_p4  ;;  %s905_s16 = int_to_ptr.vmem [resolvable:$true] %s225_s16 }
  0x16   : > { %s212_s24 = scalar_lea.sflag [#allocation3], %s211_s9  ;;  %s686_s25 = scalar_lea.hbm %s903_s14, 128 }
  0x17   : > { %p687_p3 = scmp.ne.s32.totalorder %s903_s14, %s686_s25  ;;  %p688_p5 = pneg %p909_p0 }
  0x18   : > { %s691_s28 = scalar_lea.hbm %s1036_s0, 256  ;;  %p692_p4 = scmp.lt.u32.totalorder %s903_s14, %s1036_s0 }
  0x19   : > { %p689_p6 = pnand %p688_p5, %p687_p3  ;;  %p693_p10 = scmp.lt.u32.totalorder %s691_s28, %s686_s25 }
  0x1a   : > { %p695_p12 = scmp.lt.u32.totalorder %s686_s25, %s903_s14 }
  0x1b   : > { %p690_p7 = pneg %p689_p6  ;;  %p694_p13 = por %p693_p10, %p692_p4 }
  0x1d   : > { %p696_p1 = por %p695_p12, %p694_p13 }
  0x1f   : > { %p697_p2 = pnand %p696_p1, %p690_p7 }
  0x21   : > { %700 = shalt.err (!%p697_p2)
}
  0x22   : > { %s701_s9 = scalar_lea.vmem %s905_s16, 128  ;;  %s800_s12 = smov [#allocation2]  }
  0x23   : > { %p702_p3 = scmp.ne.s32.totalorder %s905_s16, %s701_s9  ;;  %s706_s13 = sshll.u32 %s800_s12, 4  ;;  %s707_s13 = int_to_ptr.vmem [resolvable:$false] %s706_s13 }
  0x24   : > { %s708_s15 = scalar_lea.vmem %s707_s13, 256  ;;  %p709_p9 = scmp.lt.s32.totalorder %s905_s16, %s707_s13 }
  0x25   : > { %p704_p6 = pnand %p702_p3, %p688_p5  ;;  %p710_p4 = scmp.lt.s32.totalorder %s708_s15, %s701_s9 }
  0x27   : > { %p705_p11 = pneg %p704_p6  ;;  %p711_p10 = por %p710_p4, %p709_p9 }
  0x29   : > { %p712_p12 = pnand %p711_p10, %p705_p11 }
  0x2b   : > { %715 = shalt.err (!%p712_p12)
}
  0x2c   : > { %624 = dma.hbm_to_vmem [thread:$0]  (!%p909_p0), %s903_s14, 128, %s905_s16, %s212_s24  }
  0x2d   : > { %p1048_p1 = scmp.lt.s32.totalorder %s798_s23, 3  ;;  %p1049_p2 = scmp.ge.s32.totalorder %s798_s23, 1 }
  0x2f   : > { %p255_p5 = pnand %p1049_p2, %p1048_p1 }
  0x30   : > { %s945_s25 = sand.u32 (!%p255_p5), 1, %s782_s19  }
  0x31   : > { %258 = sbr.rel (%p255_p5) target bundleno = 565 (0x235), region = 40  ;;  %s604_s27 = sshll.u32 (!%p255_p5), %s945_s25, 3 }
  0x32   : > { %s261_s29 = scalar_lea.sflag (!%p255_p5), [#allocation3], %s945_s25  ;;  %s264_s17 = scalar_lea.vmem (!%p255_p5), [#allocation2], %s604_s27 }
  0x38   : > { %769 = dma.done.wait (%p881_p8), %s261_s29, 128  }
  0x39   : > { %771 = vsyncadd (%p881_p8), %s261_s29, 4294967168  ;;  %p309_p9 = scmp.lt.s32.totalorder %s790_s21, 1  ;;  %v801_v0 = vmov 0   ;;  %v359_v1 = vlaneseq  ;;  %v334_v2 = vld [vmem:[%s1040_s4] sm:$0xf]  ;;  %vm393_vm1 = vcmask 1043456  }
  0x3a   : > { %681 = vset.pattern.permute.xlu0 %v801_v0  ;;  %v326_v3 = vld [vmem:[%s264_s17] sm:$0xff]  ;;  %v802_v45 = vmov 839922192   ;;  %vm433_vm2 = vcmask 3072   ;;  %s306_s24 = scalar_lea.vmem [#allocation5], %s604_s27  ;;  %p1050_p11 = scmp.ne.s32.totalorder %s1045_s6, 0 }
  0x3b   : > { %s310_s14 = scalar_select %p309_p9, %s790_s21, 1  ;;  %354 = vperm.xlu0 %681, %v334_v2   ;;  %v336_v4 = vand.u32 2147483647, %v326_v3  ;;  %v964_v6 = vshrl.u32 %v359_v1, 7  ;;  %v335_v31 = vmax.f32 %v326_v3, 0.0  ;;  %v357_v46 = vunpack.c.l.s4 %v802_v45 }
  0x3c   : > { %v333_v58 = vld [vmem:[%s1039_s3] sm:$0xf]  ;;  %s484_s28 = sshll.u32 %s306_s24, 4  ;;  %s803_s27 = smov [#allocation5]   ;;  %s989_s28 = int_to_ptr.vmem [resolvable:$true] %s484_s28 }
  0x3d   : > { %s606_s16 = sshll.u32 %s310_s14, 1  ;;  %v337_v8 = vsub.f32 0.0, %v336_v4  ;;  %v369_v11 = vsub.s32 0, %v964_v6  ;;  %v373_v12 = vsub.s32 4, %v964_v6  ;;  %v358_v47 = vunpack.c.0.s8 %v357_v46  ;;  %s609_s14 = sshll.u32 %s790_s21, 7 }
  0x3e   : > { %s324_s10 = scalar_lea.vmem %s1038_s2, %s606_s16  ;;  %s315_s13 = scalar_lea.vmem %s1037_s1, %s606_s16  ;;  %vm458_vm3 = vcmp.eq.s32.totalorder %v964_v6, 0 }
  0x3f   : > { %v330_v5 = vld [vmem:[%s324_s10] sm:$0x3]  ;;  %v338_v10 = vmul.f32 1.442695, %v337_v8  ;;  %v361_v48 = vsub.s32 %v358_v47, %v964_v6  ;;  %s987_s9 = scalar_lea.hbm %s1041_s5, %s609_s14  ;;  %s470_s21 = scalar_lea.sflag [#allocation4], %s945_s25 }
  0x40   : > { %v331_v7 = vunpack.c.0.s8 %v330_v5  ;;  %v327_v22 = vld [vmem:[%s315_s13] sm:$0x3]  ;;  %s716_s30 = scalar_lea.vmem %s989_s28, 128  ;;  %s720_s12 = sshll.u32 %s803_s27, 4  ;;  %s721_s12 = int_to_ptr.vmem [resolvable:$false] %s720_s12 }
  0x41   : > { %682 = vpow2.f32 %v338_v10  ;;  %v328_v23 = vunpack.c.0.s8 %v327_v22  ;;  %p717_p8 = scmp.ne.s32.totalorder %s989_s28, %s716_s30  ;;  %s722_s13 = scalar_lea.vmem %s721_s12, 256 }
  0x42   : > { %v332_v9 = vcvt.s32.f32 %v331_v7  ;;  %p723_p13 = scmp.lt.s32.totalorder %s989_s28, %s721_s12  ;;  %p724_p3 = scmp.lt.s32.totalorder %s722_s13, %s716_s30 }
  0x43   : > { %v329_v28 = vcvt.s32.f32 %v328_v23  ;;  %p718_p0 = pnand %p717_p8, %p1050_p11 }
  0x44   : > { %v399_v13 = vsub.f32 1.0, %v332_v9  ;;  %v370_v26 = vrot.slane %v332_v9, %v369_v11  ;;  %v374_v27 = vrot.slane %v332_v9, %v373_v12  ;;  %p725_p6 = por %p724_p3, %p723_p13 }
  0x45   : > { %v350_v35 = vmul.f32 %v329_v28, %v326_v3  ;;  %p719_p7 = pneg %p718_p0 }
  0x46   : > { %v404_v14 = vrot.slane %v399_v13, %v369_v11  ;;  %v408_v15 = vrot.slane %v399_v13, %v373_v12  ;;  %v380_v32 = vrot.slane %v370_v26, %v369_v11  ;;  %v384_v33 = vrot.slane %v374_v27, %v369_v11 }
  0x47   : > { %p726_p4 = pnand %p725_p6, %p719_p7 }
  0x48   : > { %v414_v16 = vrot.slane %v404_v14, %v369_v11  ;;  %v418_v17 = vrot.slane %v408_v15, %v369_v11  ;;  %v387_v38 = vcombine.low %v380_v32, %v384_v33 }
  0x4a   : > { %v421_v18 = vcombine.low %v414_v16, %v418_v17  ;;  %v457_v16 = vand.u32 127, %v359_v1 }
  0x4b   : > { %v683_v19 = vpop.eup %682 }
  0x4c   : > { %v340_v20 = vadd.f32 1.0, %v683_v19  ;;  %v343_v21 = vmul.f32 -0.5, %v683_v19  ;;  %v346_v25 = vand.u32 2147483647, %v683_v19  ;;  %vm459_vm4 = vcmp.eq.s32.totalorder %v457_v16, 0 }
  0x4d   : > { %vm463_vm5 = vcmp.eq.s32.totalorder %v457_v16, 1  ;;  %vm460_vm6 = vmand %vm458_vm3, %vm459_vm4 }
  0x4e   : > { %684 = vlog2.f32 %v340_v20  ;;  %v344_v24 = vadd.f32 1.0, %v343_v21  ;;  %vm347_vm0 = vcmp.lt.f32.partialorder %v346_v25, 0.0004427343  ;;  %vm464_vm7 = vmand %vm458_vm3, %vm463_vm5 }
  0x50   : > { %v345_v29 = vmul.f32 %v683_v19, %v344_v24 }
  0x58   : > { %v685_v30 = vpop.eup %684 }
  0x59   : > { %v342_v34 = vmul.f32 0.6931472, %v685_v30 }
  0x5b   : > { %v348_v36 = vsel %vm347_vm0, %v345_v29, %v342_v34 }
  0x5c   : > { %v349_v37 = vadd.f32 %v348_v36, %v335_v31 }
  0x5e   : > { %v351_v39 = vsub.f32 %v349_v37, %v350_v35 }
  0x60   : > { %v389_v40 = vmul.f32 %v387_v38, %v351_v39 }
  0x62   : > { %v391_v41 = vcombine.high %v389_v40, %v389_v40  ;;  %v394_v42 = vsel %vm393_vm1, %v389_v40, 0.0 }
  0x64   : > { %v395_v43 = vsel %vm393_vm1, %v391_v41, 0.0 }
  0x65   : > { %v396_v44 = vadd.f32 %v395_v43, %v394_v42 }
  0x67   : > { %397 = vadd.xlane.f32.xlu0 %v396_v44 }
  0xba   : > { %v355_v49 = vpop.permute.xlu0 %354 }
  0xbb   : > { %v362_v50 = vrot.slane %v355_v49, %v361_v48 }
  0xbd   : > { %v364_v51 = vmul.f32 %v362_v50, %v326_v3 }
  0xbf   : > { %v365_v52 = vsub.f32 %v349_v37, %v364_v51 }
  0xc1   : > { %v423_v53 = vmul.f32 %v421_v18, %v365_v52 }
  0xc3   : > { %v425_v54 = vcombine.high %v423_v53, %v423_v53  ;;  %v427_v55 = vsel %vm393_vm1, %v423_v53, 0.0 }
  0xc5   : > { %v428_v56 = vsel %vm393_vm1, %v425_v54, 0.0 }
  0xc6   : > { %v429_v57 = vadd.f32 %v428_v56, %v427_v55 }
  0xc8   : > { %430 = vadd.xlane.f32.xlu1 %v429_v57 }
  0xf4   : > { %v398_v59 = vpop.xlane.xlu0 %397 }
  0xf5   : > { %v432_v60 = vmul.f32 %v398_v59, %v333_v58 }
  0xf7   : > { %v434_v61 = vsel %vm433_vm2, %v432_v60, 0.0 }
  0xf8   : > { %435 = vadd.xlane.f32.xlu1 %v434_v61 }
 0x155   : > { %v431_v62 = vpop.xlane.xlu1 %430 }
 0x156   : > { %v444_v63 = vsel %vm433_vm2, %v431_v62, 0.0 }
 0x157   : > { %445 = vadd.xlane.f32.xlu1 %v444_v63 }
 0x185   : > { %v436_v0 = vpop.xlane.xlu1 %435 }
 0x186   : > { %v437_v2 = vrot.slane %v436_v0, 4 }
 0x188   : > { %v438_v3 = vadd.f32 %v437_v2, %v436_v0 }
 0x18a   : > { %v439_v4 = vrot.slane %v438_v3, 2 }
 0x18c   : > { %v440_v5 = vadd.f32 %v439_v4, %v438_v3 }
 0x18e   : > { %v441_v7 = vrot.slane %v440_v5, 1 }
 0x190   : > { %v442_v8 = vadd.f32 %v441_v7, %v440_v5 }
 0x192   : > { %613 = vpush %v442_v8 }
 0x1c3   : > { %s614_s17 = spop %613 }
 0x1c4   : > { %v461_v17 = vstv %s614_s17 }
 0x1c5   : > { %v462_v19 = vsel %vm460_vm6, %v461_v17, 0.0 }
 0x1e4   : > { %v446_v9 = vpop.xlane.xlu1 %445 }
 0x1e5   : > { %v447_v10 = vrot.slane %v446_v9, 4 }
 0x1e7   : > { %v448_v11 = vadd.f32 %v447_v10, %v446_v9 }
 0x1e9   : > { %v449_v12 = vrot.slane %v448_v11, 2 }
 0x1eb   : > { %v450_v13 = vadd.f32 %v449_v12, %v448_v11 }
 0x1ed   : > { %v451_v14 = vrot.slane %v450_v13, 1 }
 0x1ef   : > { %v452_v15 = vadd.f32 %v451_v14, %v450_v13 }
 0x1f1   : > { %615 = vpush %v452_v15 }
 0x222   : > { %s616_s16 = spop %615 }
 0x223   : > { %v465_v18 = vstv %s616_s16 }
 0x224   : > { %v466_v20 = vsel %vm464_vm7, %v465_v18, 0.0 }
 0x225   : > { %v467_v21 = vadd.f32 %v466_v20, %v462_v19 }
 0x227   : > { %468 = vst [vmem:[%s306_s24] sm:$0xff] %v467_v21 }
 0x228   : > { %729 = shalt.err (!%p726_p4)
}
 0x229   : > { %s730_s25 = scalar_lea.hbm %s987_s9, 128  ;;  %s734_s17 = scalar_lea.hbm %s1041_s5, 256 }
 0x22a   : > { %p731_p10 = scmp.ne.s32.totalorder %s987_s9, %s730_s25  ;;  %p735_p2 = scmp.lt.u32.totalorder %s987_s9, %s1041_s5 }
 0x22b   : > { %p736_p5 = scmp.lt.u32.totalorder %s734_s17, %s730_s25  ;;  %p738_p8 = scmp.lt.u32.totalorder %s730_s25, %s987_s9 }
 0x22c   : > { %p732_p12 = pnand %p731_p10, %p1050_p11 }
 0x22d   : > { %p737_p9 = por %p736_p5, %p735_p2 }
 0x22e   : > { %p733_p1 = pneg %p732_p12 }
 0x22f   : > { %p739_p0 = por %p738_p8, %p737_p9 }
 0x231   : > { %p740_p7 = pnand %p739_p0, %p733_p1 }
 0x233   : > { %743 = shalt.err (!%p740_p7)
}
 0x234   : > { %619 = dma.vmem_to_hbm [thread:$0]  (%p1050_p11), %s989_s28, 128, %s987_s9, %s470_s21  }
 0x235 PF: > { %s496_s24 = sand.u32 1, %s778_s18   ;;  %p1051_p13 = scmp.ne.s32.totalorder %s1046_s8, 0 }
 0x236   : > { %p1052_p3 = scmp.ge.s32.totalorder %s798_s23, 2  ;;  %s497_s10 = scalar_lea.sflag [#allocation4], %s496_s24 }
 0x238   : > { %p626_p6 = pnand %p1052_p3, %p1051_p13 }
 0x23a   : > { %773 = dma.done.wait (!%p626_p6), %s497_s10, 128  }
 0x23b   : > { %775 = vsyncadd (!%p626_p6), %s497_s10, 4294967168  ;;  %s21_s23 = sadd.s32 1, %s798_s23   ;;  %s1053_s18 = smov %s782_s19 }
 0x23c   : > { %p18_p4 = scmp.ge.s32.totalorder %s21_s23, 4   ;;  %s1054_s19 = smov %s786_s20 }
 0x23d   : > { %s1055_s20 = smov %s890_s7  ;;  %s1056_s21 = smov %s794_s22 }
 0x23e   : > { %s1057_s22 = smov %s1059_s26  ;;  %20 = sbr.rel (!%p18_p4) target bundleno = 6 (0x6), region = 91 }
 0x245   :  { %502 = vsyncpa [#allocation3], 1 }
 0x246   :  { %504 = vsyncpa [#allocation3 + $0x1], 1 }
 0x247   :  { %505 = vsyncpa [#allocation4], 1 }
 0x248   :  { %507 = vsyncpa [#allocation4 + $0x1], 1 }

</bundles_post_ra>
